<compile_context>
chip_gen: v5e
topology: v5e:2x2
jax: 0.10.0
libtpu: 0.0.40
codegen_flags: <defaults>
</compile_context>

<pallas_src>
import functools

import jax
import jax.numpy as jnp
from jax.experimental import pallas as pl
from jax.experimental.pallas import tpu as pltpu

EPSILON = 1e-05


# --------------------------------------------------------------------------- helpers
def _vmem_budget_bytes() -> int:
    """Per-generation VMEM budget (leave ~25% headroom for compiler scratch)."""
    phys = 64 * 1024 * 1024                     # conservative default (v7x physical VMEM)
    try:
        info = pltpu.get_tpu_info()
        phys = int(getattr(info, "vmem_capacity_bytes", phys))
    except Exception:
        pass
    return min((phys * 3) // 4, 96 * 1024 * 1024)


def _choose_tiling(n, c, hw, in_itemsize, out_itemsize, budget_bytes, max_block_bytes=None):
    """Pick (n_blk, hw_tile) for the streamed two-pass path.

    Pass 2 double-buffers both the streamed x block and the streamed out block, so the
    per-step VMEM cost is ~2*(in+out) bytes per block element.  Pick the largest
    lane-dense hw tile that fits; when a whole (C, HW) slab is small, pack multiple
    batch items per block so each grid step moves a multi-MiB block.
    """
    per_elem = 2 * (in_itemsize + out_itemsize)
    limit = max_block_bytes if max_block_bytes is not None else budget_bytes
    max_block_elems = max(limit // per_elem, c * 128)
    target_block_bytes = 8 * 1024 * 1024        # aim for multi-MiB streamed blocks

    if c * hw <= max_block_elems:
        hw_tile = hw
    else:
        hw_tile = None
        for cand in range(128, hw, 128):        # lane-dense divisors of hw
            if hw % cand == 0 and c * cand <= max_block_elems:
                hw_tile = cand                  # keep the largest that fits
        if hw_tile is None:
            # TODO(synk): odd H*W that is also too large for the budget would need
            # masked partial blocks; fall back to the (always legal) full-extent block.
            hw_tile = hw

    n_blk = 1
    if hw_tile == hw:
        # Pack several batch items per block (contiguous in HBM for the (N,C,HW) view).
        for d in range(n, 0, -1):
            if n % d:
                continue
            blk = d * c * hw
            if blk <= max_block_elems and blk * in_itemsize <= target_block_bytes:
                n_blk = d
                break
    return n_blk, hw_tile


# --------------------------------------------------------------------------- kernels
def _fused_kernel(x_ref, gamma_ref, beta_ref, o_ref, *, m_total):
    """Small-activation fast path: x stays resident in VMEM (read once, write once)."""
    x = x_ref[...].astype(jnp.float32)                                        # (N, C, HW)
    s1 = jnp.sum(jnp.sum(x, axis=2, keepdims=True), axis=0, keepdims=True)    # (1, C, 1)
    s2 = jnp.sum(jnp.sum(x * x, axis=2, keepdims=True), axis=0, keepdims=True)
    mean = s1 / m_total
    # torch.var default is unbiased (divisor m-1): var = (sumsq - sum*mean) / (m-1)
    var = (s2 - s1 * mean) / (m_total - 1.0)
    # NOTE: the module uses sqrt(var - eps) (not var + eps); reproduced faithfully (EUP rsqrt).
    inv_std = jax.lax.rsqrt(var - EPSILON)
    scale = gamma_ref[...] * inv_std                                          # (1, C, 1)
    shift = beta_ref[...] - scale * mean
    o_ref[...] = (x * scale + shift).astype(o_ref.dtype)


def _partial_stats_kernel(x_ref, s1_ref, s2_ref):
    """Pass 1: per-N-block partial sum / sum-of-squares, reduced over hw tiles."""
    @pl.when(pl.program_id(1) == 0)
    def _():
        s1_ref[...] = jnp.zeros_like(s1_ref)
        s2_ref[...] = jnp.zeros_like(s2_ref)

    x = x_ref[...].astype(jnp.float32)                                        # (n_blk, C, hw_tile)
    s1_ref[...] += jnp.sum(jnp.sum(x, axis=2, keepdims=True), axis=0)         # (C, 1)
    s2_ref[...] += jnp.sum(jnp.sum(x * x, axis=2, keepdims=True), axis=0)     # (C, 1)


def _norm_kernel(x_ref, scale_ref, shift_ref, o_ref):
    """Pass 2: y = x * scale + shift, one lane-dense full-tile store per step."""
    x = x_ref[...].astype(jnp.float32)                                        # (n_blk, C, hw_tile)
    o_ref[...] = (x * scale_ref[...] + shift_ref[...]).astype(o_ref.dtype)


# --------------------------------------------------------------------------- wrapper
@functools.partial(jax.jit, static_argnames=("force_two_pass", "max_block_bytes"))
def batch_norm_pallas(x_nchw, gamma, beta, *, force_two_pass=False, max_block_bytes=None):
    """x_nchw: (N, C, H, W); gamma/beta: (C,).  Matches the PyTorch module's forward."""
    n, c, h, w = x_nchw.shape
    assert gamma.shape == (c,) and beta.shape == (c,)
    hw = h * w
    # N*H*W elements per channel; m==1 is degenerate (div by zero), same as torch.var.
    m_total = float(n * hw)

    x3 = x_nchw.reshape(n, c, hw)          # metadata-only: native NCHW layout
    in_bytes = x3.dtype.itemsize
    out_bytes = in_bytes
    budget = _vmem_budget_bytes()

    gamma_f = gamma.astype(jnp.float32)
    beta_f = beta.astype(jnp.float32)

    # -------- fast path: whole activation resident in VMEM (2 HBM passes) ------------
    footprint = n * c * hw * (in_bytes + out_bytes + 8)       # blocks + f32 temporaries
    if (not force_two_pass) and footprint <= (2 * budget) // 3:
        out3 = pl.pallas_call(
            functools.partial(_fused_kernel, m_total=m_total),
            out_shape=jax.ShapeDtypeStruct((n, c, hw), x3.dtype),
            grid=(1,),
            in_specs=[
                pl.BlockSpec((n, c, hw), lambda i: (0, 0, 0)),
                pl.BlockSpec((1, c, 1), lambda i: (0, 0, 0)),
                pl.BlockSpec((1, c, 1), lambda i: (0, 0, 0)),
            ],
            out_specs=pl.BlockSpec((n, c, hw), lambda i: (0, 0, 0)),
            compiler_params=pltpu.CompilerParams(
                dimension_semantics=("arbitrary",),
                vmem_limit_bytes=budget,
            ),
        )(x3, gamma_f.reshape(1, c, 1), beta_f.reshape(1, c, 1))
        return out3.reshape(n, c, h, w)

    # -------- two-pass path -----------------------------------------------------------
    n_blk, hw_tile = _choose_tiling(n, c, hw, in_bytes, out_bytes, budget, max_block_bytes)
    n_grid, hw_grid = n // n_blk, hw // hw_tile
    # TODO(synk): for C < 8 sublanes are partially populated; a sublane-dense (N*C, HW)
    # row-blocked view would need a strided per-channel combine - skipped since the op
    # stays HBM-bandwidth-bound with lane-dense multi-MiB blocks.

    # Pass 1: per-N-block partial sums.  N axis "parallel" (shards across v7x's 2 TCs),
    # hw axis "arbitrary" (accumulates into the resident (C,1) output block).
    s1, s2 = pl.pallas_call(
        _partial_stats_kernel,
        out_shape=(jax.ShapeDtypeStruct((n_grid, c, 1), jnp.float32),
                   jax.ShapeDtypeStruct((n_grid, c, 1), jnp.float32)),
        grid_spec=pltpu.PrefetchScalarGridSpec(
            num_scalar_prefetch=0,
            grid=(n_grid, hw_grid),
            in_specs=[pl.BlockSpec((n_blk, c, hw_tile), lambda ni, ti: (ni, 0, ti))],
            out_specs=(pl.BlockSpec((None, c, 1), lambda ni, ti: (ni, 0, 0)),
                       pl.BlockSpec((None, c, 1), lambda ni, ti: (ni, 0, 0))),
        ),
        compiler_params=pltpu.CompilerParams(
            dimension_semantics=("parallel", "arbitrary"),
            vmem_limit_bytes=budget,
        ),
    )(x3)

    # Tiny O(N*C) combine + gamma/beta fold in plain JAX (fused by XLA under jit).
    s1_tot = jnp.sum(s1, axis=0)                               # (C, 1)
    s2_tot = jnp.sum(s2, axis=0)
    mean = s1_tot / m_total
    var = (s2_tot - s1_tot * mean) / (m_total - 1.0)
    inv_std = jax.lax.rsqrt(var - EPSILON)                     # sqrt(var - eps), as in the module
    g2 = gamma_f.reshape(c, 1)
    scale = (g2 * inv_std).reshape(1, c, 1)
    shift = (beta_f.reshape(c, 1) - g2 * inv_std * mean).reshape(1, c, 1)

    # Pass 2: fully parallel normalize, a single fused multiply-add per element.
    out3 = pl.pallas_call(
        _norm_kernel,
        out_shape=jax.ShapeDtypeStruct((n, c, hw), x3.dtype),
        grid_spec=pltpu.PrefetchScalarGridSpec(
            num_scalar_prefetch=0,
            grid=(n_grid, hw_grid),
            in_specs=[
                pl.BlockSpec((n_blk, c, hw_tile), lambda ni, ti: (ni, 0, ti)),
                pl.BlockSpec((1, c, 1), lambda ni, ti: (0, 0, 0)),
                pl.BlockSpec((1, c, 1), lambda ni, ti: (0, 0, 0)),
            ],
            out_specs=pl.BlockSpec((n_blk, c, hw_tile), lambda ni, ti: (ni, 0, ti)),
        ),
        compiler_params=pltpu.CompilerParams(
            dimension_semantics=("parallel", "parallel"),
            vmem_limit_bytes=budget,
        ),
    )(x3, scale, shift)
    # TODO(synk): if odd H*W ever forces sub-MiB blocks, add pipeline_mode=pl.Buffered(3)
    # on the streamed x/out BlockSpecs to keep the DMA engines busy.

    return out3.reshape(n, c, h, w)


if __name__ == "__main__":
    key = jax.random.PRNGKey(0)
    N, C, H, W = 2, 4, 16, 16

    x = jax.random.normal(key, (N, C, H, W), dtype=jnp.float32)
    # Deterministic, non-trivial affine parameters (the module trains gamma/beta anyway).
    gamma = 1.0 + 0.1 * jnp.arange(C, dtype=jnp.float32)
    beta = 0.05 * jnp.arange(C, dtype=jnp.float32)

    # Exercise every code path on the small demo shape:
    out_fast = batch_norm_pallas(x, gamma, beta)                           # fused VMEM-resident path
    out_two = batch_norm_pallas(x, gamma, beta, force_two_pass=True)       # two-pass, multi-N blocks
    out_tiled = batch_norm_pallas(x, gamma, beta, force_two_pass=True,
                                  max_block_bytes=8192)                    # two-pass, tiled hw axis
    outs = jax.block_until_ready((out_fast, out_two, out_tiled))

    # Plain-JAX reference with identical semantics (unbiased var, sqrt(var - eps)).
    mean_ref = jnp.mean(x, axis=(0, 2, 3))
    var_ref = jnp.var(x, axis=(0, 2, 3), ddof=1)
    ref = (x - mean_ref[None, :, None, None]) / jnp.sqrt(
        var_ref[None, :, None, None] - EPSILON)
    ref = gamma[None, :, None, None] * ref + beta[None, :, None, None]

    for out in outs:
        assert out.shape == (N, C, H, W)
        assert jnp.allclose(out, ref, atol=1e-4, rtol=1e-4)
    print("KERNEL_OK")
</pallas_src>

<mosaic_0001>
module attributes {stable_mosaic.version = 11 : i64} {
  func.func @_fused_kernel(%arg0: i32, %arg1: memref<2x4x256xf32, #tpu.memory_space<vmem>>, %arg2: memref<1x4x1xf32, #tpu.memory_space<vmem>>, %arg3: memref<1x4x1xf32, #tpu.memory_space<vmem>>, %arg4: memref<2x4x256xf32, #tpu.memory_space<vmem>>) attributes {dimension_semantics = [#tpu.dimension_semantics<arbitrary>], iteration_bounds = array<i64: 1>, scalar_prefetch = 0 : i64, scratch_operands = 0 : i64, tpu.core_type = #tpu.core_type<tc>, window_params = [{pipeline_mode = #tpu.pipeline_mode<synchronous>, transform_indices = @transform_0, window_bounds = array<i64: 2, 4, 256>}, {pipeline_mode = #tpu.pipeline_mode<synchronous>, transform_indices = @transform_1, window_bounds = array<i64: 1, 4, 1>}, {pipeline_mode = #tpu.pipeline_mode<synchronous>, transform_indices = @transform_2, window_bounds = array<i64: 1, 4, 1>}, {pipeline_mode = #tpu.pipeline_mode<synchronous>, transform_indices = @transform_3, window_bounds = array<i64: 2, 4, 256>}]} {
    %c0 = arith.constant 0 : index
    %c0_0 = arith.constant 0 : index
    %c0_1 = arith.constant 0 : index
    %0 = vector.load %arg1[%c0, %c0_0, %c0_1] : memref<2x4x256xf32, #tpu.memory_space<vmem>>, vector<2x4x256xf32>
    %cst = arith.constant dense<0.000000e+00> : vector<2x4xf32>
    %1 = vector.multi_reduction <add>, %0, %cst [2] : vector<2x4x256xf32> to vector<2x4xf32>
    %2 = vector.shape_cast %1 : vector<2x4xf32> to vector<2x4x1xf32>
    %cst_2 = arith.constant dense<0.000000e+00> : vector<4x1xf32>
    %3 = vector.multi_reduction <add>, %2, %cst_2 [0] : vector<2x4x1xf32> to vector<4x1xf32>
    %4 = vector.shape_cast %3 : vector<4x1xf32> to vector<1x4x1xf32>
    %5 = arith.mulf %0, %0 : vector<2x4x256xf32>
    %cst_3 = arith.constant dense<0.000000e+00> : vector<2x4xf32>
    %6 = vector.multi_reduction <add>, %5, %cst_3 [2] : vector<2x4x256xf32> to vector<2x4xf32>
    %7 = vector.shape_cast %6 : vector<2x4xf32> to vector<2x4x1xf32>
    %cst_4 = arith.constant dense<0.000000e+00> : vector<4x1xf32>
    %8 = vector.multi_reduction <add>, %7, %cst_4 [0] : vector<2x4x1xf32> to vector<4x1xf32>
    %9 = vector.shape_cast %8 : vector<4x1xf32> to vector<1x4x1xf32>
    %cst_5 = arith.constant 5.120000e+02 : f32
    %10 = vector.broadcast %cst_5 : f32 to vector<1x4x1xf32>
    %11 = arith.divf %4, %10 : vector<1x4x1xf32>
    %12 = arith.mulf %4, %11 : vector<1x4x1xf32>
    %13 = arith.subf %9, %12 : vector<1x4x1xf32>
    %cst_6 = arith.constant 5.110000e+02 : f32
    %14 = vector.broadcast %cst_6 : f32 to vector<1x4x1xf32>
    %15 = arith.divf %13, %14 : vector<1x4x1xf32>
    %cst_7 = arith.constant 9.99999974E-6 : f32
    %16 = vector.broadcast %cst_7 : f32 to vector<1x4x1xf32>
    %17 = arith.subf %15, %16 : vector<1x4x1xf32>
    %18 = math.rsqrt %17 : vector<1x4x1xf32>
    %c0_8 = arith.constant 0 : index
    %c0_9 = arith.constant 0 : index
    %c0_10 = arith.constant 0 : index
    %19 = vector.load %arg2[%c0_8, %c0_9, %c0_10] : memref<1x4x1xf32, #tpu.memory_space<vmem>>, vector<1x4x1xf32>
    %20 = arith.mulf %19, %18 : vector<1x4x1xf32>
    %c0_11 = arith.constant 0 : index
    %c0_12 = arith.constant 0 : index
    %c0_13 = arith.constant 0 : index
    %21 = vector.load %arg3[%c0_11, %c0_12, %c0_13] : memref<1x4x1xf32, #tpu.memory_space<vmem>>, vector<1x4x1xf32>
    %22 = arith.mulf %20, %11 : vector<1x4x1xf32>
    %23 = arith.subf %21, %22 : vector<1x4x1xf32>
    %24 = vector.broadcast %20 : vector<1x4x1xf32> to vector<2x4x256xf32>
    %25 = arith.mulf %0, %24 : vector<2x4x256xf32>
    %26 = vector.broadcast %23 : vector<1x4x1xf32> to vector<2x4x256xf32>
    %27 = arith.addf %25, %26 : vector<2x4x256xf32>
    %c0_14 = arith.constant 0 : index
    %c0_15 = arith.constant 0 : index
    %c0_16 = arith.constant 0 : index
    %28 = vector.load %arg4[%c0_14, %c0_15, %c0_16] : memref<2x4x256xf32, #tpu.memory_space<vmem>>, vector<2x4x256xf32>
    tpu.vector_store %arg4[%c0_14, %c0_15, %c0_16], %27 {strides = array<i32>} : memref<2x4x256xf32, #tpu.memory_space<vmem>>, vector<2x4x256xf32>,
    return
  }
  func.func @transform_0(%arg0: i32) -> (i32, i32, i32) {
    %c0_i32 = arith.constant 0 : i32
    %c0_i32_0 = arith.constant 0 : i32
    %c0_i32_1 = arith.constant 0 : i32
    %c0_i32_2 = arith.constant 0 : i32
    return %c0_i32, %c0_i32_0, %c0_i32_1 : i32, i32, i32
  }
  func.func @transform_1(%arg0: i32) -> (i32, i32, i32) {
    %c0_i32 = arith.constant 0 : i32
    %c0_i32_0 = arith.constant 0 : i32
    %c0_i32_1 = arith.constant 0 : i32
    %c0_i32_2 = arith.constant 0 : i32
    return %c0_i32, %c0_i32_0, %c0_i32_1 : i32, i32, i32
  }
  func.func @transform_2(%arg0: i32) -> (i32, i32, i32) {
    %c0_i32 = arith.constant 0 : i32
    %c0_i32_0 = arith.constant 0 : i32
    %c0_i32_1 = arith.constant 0 : i32
    %c0_i32_2 = arith.constant 0 : i32
    return %c0_i32, %c0_i32_0, %c0_i32_1 : i32, i32, i32
  }
  func.func @transform_3(%arg0: i32) -> (i32, i32, i32) {
    %c0_i32 = arith.constant 0 : i32
    %c0_i32_0 = arith.constant 0 : i32
    %c0_i32_1 = arith.constant 0 : i32
    %c0_i32_2 = arith.constant 0 : i32
    return %c0_i32, %c0_i32_0, %c0_i32_1 : i32, i32, i32
  }
}

</mosaic_0001>

<bundles_post_ra>
// kernel: batch_norm_pallas.1
= control target key start
LH: loop header
LB: loop body
LE: loop exit
PB: predicated region body
PF: predicated region fallthrough
CT: control target
= control target key end

     0   :  { %vm29_vm0 = vcmask 1043456   ;;  %v146_v24 = vmov 512.0   ;;  %v147_v26 = vmov 511.0   ;;  %v148_v31 = vmov 0   ;;  %s212_s0 = inlined_call_operand.vmem [shape: f32[2,4,256], index: 0, kind: input, shape index: {}]   ;;  %s213_s1 = inlined_call_operand.vmem [shape: f32[1,4,1], index: 1, kind: input, shape index: {}]   ;;  %s214_s2 = inlined_call_operand.vmem [shape: f32[1,4,1], index: 2, kind: input, shape index: {}]   ;;  %s215_s3 = inlined_call_operand.vmem [shape: f32[2,4,256], index: 3, kind: output, shape index: {}]  }
   0x1   :  { %v173_v0 = vld [vmem:[%s212_s0] sm:$0xff]  ;;  %v178_v1 = vld [vmem:[%s212_s0 + $0x8] sm:$0xff]  ;;  %140 = vrcp.f32 %v146_v24  ;;  %138 = vset.pattern.permute.xlu2 %v148_v31  ;;  %139 = vset.pattern.permute.xlu0 %v148_v31 }
   0x2   :  { %18 = vst [vmem:[#allocation1] ss:$2 sm:$0xff] %v173_v0  ;;  %v43_v2 = vmul.f32 %v173_v0, %v173_v0  ;;  %v44_v3 = vmul.f32 %v178_v1, %v178_v1  ;;  %142 = vrcp.f32 %v147_v26  ;;  %v100_v60 = vld [vmem:[%s213_s1] sm:$0xf] }
   0x3   :  { %22 = vst [vmem:[#allocation1 + $0x10] ss:$2 sm:$0xff] %v178_v1 }
   0x7   :  { %v141_v25 = vpop.eup %140 }
   0x8   :  { %v72_v27 = vmul.f32 512.0, %v141_v25  ;;  %v143_v29 = vpop.eup %142  ;;  %vm76_vm1 = vweird.f32 %v141_v25 }
   0x9   :  { %v19_v4 = vld.sshfl [vmem:[#allocation1] sm:$0xff pattern:$0x75316420]  ;;  %v20_v5 = vld.sshfl [vmem:[#allocation1 + $0x8] sm:$0xff pattern:$0x75316420]  ;;  %vm86_vm2 = vweird.f32 %v143_v29 }
   0xa   :  { %v30_v6 = vsel %vm29_vm0, %v19_v4, 0.0  ;;  %v31_v7 = vsel %vm29_vm0, %v20_v5, 0.0  ;;  %47 = vst [vmem:[#allocation1] ss:$2 sm:$0xff] %v43_v2  ;;  %v73_v28 = vsub.f32 1.0, %v72_v27  ;;  %v82_v33 = vmul.f32 511.0, %v143_v29 }
   0xb   :  { %v32_v8 = vadd.f32 %v31_v7, %v30_v6  ;;  %v23_v9 = vld.sshfl [vmem:[#allocation1 + $0x10] sm:$0xff pattern:$0x75316420]  ;;  %v24_v10 = vld.sshfl [vmem:[#allocation1 + $0x18] sm:$0xff pattern:$0x75316420] }
   0xc   :  { %51 = vst [vmem:[#allocation1 + $0x10] ss:$2 sm:$0xff] %v44_v3  ;;  %v35_v11 = vsel %vm29_vm0, %v23_v9, 0.0  ;;  %v36_v12 = vsel %vm29_vm0, %v24_v10, 0.0  ;;  %v74_v32 = vmul.f32 %v141_v25, %v73_v28  ;;  %v83_v35 = vsub.f32 1.0, %v82_v33 }
   0xd   :  { %33 = vadd.xlane.f32.xlu0 %v32_v8  ;;  %v37_v15 = vadd.f32 %v36_v12, %v35_v11  ;;  %v102_v2 = vld [vmem:[%s214_s2] sm:$0xf]  ;;  %v149_v4 = vmov 839922192  }
   0xe   :  { %v75_v34 = vadd.f32 %v141_v25, %v74_v32  ;;  %v84_v42 = vmul.f32 %v143_v29, %v83_v35  ;;  %v110_v5 = vunpack.c.l.s4 %v149_v4 }
  0x10   :  { %v77_v41 = vsel %vm76_vm1, %v141_v25, %v75_v34  ;;  %v85_v44 = vadd.f32 %v143_v29, %v84_v42  ;;  %v111_v7 = vunpack.c.0.s8 %v110_v5 }
  0x11   :  { %v48_v13 = vld.sshfl [vmem:[#allocation1] sm:$0xff pattern:$0x75316420]  ;;  %v49_v14 = vld.sshfl [vmem:[#allocation1 + $0x8] sm:$0xff pattern:$0x75316420] }
  0x12   :  { %v58_v16 = vsel %vm29_vm0, %v48_v13, 0.0  ;;  %v59_v17 = vsel %vm29_vm0, %v49_v14, 0.0  ;;  %v87_v50 = vsel %vm86_vm2, %v143_v29, %v85_v44 }
  0x13   :  { %v60_v18 = vadd.f32 %v59_v17, %v58_v16  ;;  %v52_v19 = vld.sshfl [vmem:[#allocation1 + $0x10] sm:$0xff pattern:$0x75316420]  ;;  %v53_v20 = vld.sshfl [vmem:[#allocation1 + $0x18] sm:$0xff pattern:$0x75316420] }
  0x14   :  { %v63_v21 = vsel %vm29_vm0, %v52_v19, 0.0  ;;  %v64_v22 = vsel %vm29_vm0, %v53_v20, 0.0 }
  0x15   :  { %61 = vadd.xlane.f32.xlu1 %v60_v18  ;;  %38 = vadd.xlane.f32.xlu0 %v37_v15  ;;  %v65_v23 = vadd.f32 %v64_v22, %v63_v21 }
  0x1d   :  { %66 = vadd.xlane.f32.xlu1 %v65_v23 }
  0x80   :  { %v34_v30 = vpop.xlane.xlu0 %33 }
  0x81   :  { %v40_v38 = vsel %vm29_vm0, %v34_v30, 0.0 }
  0x88   :  { %v62_v36 = vpop.xlane.xlu1 %61  ;;  %v39_v37 = vpop.xlane.xlu0 %38 }
  0x89   :  { %v41_v39 = vsel %vm29_vm0, %v39_v37, 0.0  ;;  %v68_v46 = vsel %vm29_vm0, %v62_v36, 0.0 }
  0x8a   :  { %v42_v40 = vadd.f32 %v41_v39, %v40_v38 }
  0x8c   :  { %v78_v43 = vmul.f32 %v77_v41, %v42_v40 }
  0x8e   :  { %v79_v48 = vmul.f32 %v78_v43, %v42_v40 }
  0x90   :  { %v67_v45 = vpop.xlane.xlu1 %66 }
  0x91   :  { %v69_v47 = vsel %vm29_vm0, %v67_v45, 0.0 }
  0x92   :  { %v70_v49 = vadd.f32 %v69_v47, %v68_v46 }
  0x94   :  { %v80_v51 = vsub.f32 %v70_v49, %v79_v48 }
  0x96   :  { %v88_v52 = vmul.f32 %v87_v50, %v80_v51 }
  0x98   :  { %v133_v53 = vadd.f32 -1e-05, %v88_v52 }
  0x9a   :  { %144 = vrsqrt.f32 %v133_v53  ;;  %vm96_vm4 = vweird.f32 %v133_v53 }
  0xa0   :  { %v145_v54 = vpop.eup %144 }
  0xa1   :  { %v91_v55 = vmul.f32 %v145_v54, %v133_v53  ;;  %vm97_vm3 = vweird.f32 %v145_v54 }
  0xa2   :  { %vm98_vm5 = vmor %vm96_vm4, %vm97_vm3 }
  0xa3   :  { %v92_v56 = vmul.f32 %v145_v54, %v91_v55 }
  0xa5   :  { %v93_v57 = vmul.f32 0.5, %v92_v56 }
  0xa7   :  { %v94_v58 = vsub.f32 1.5, %v93_v57 }
  0xa9   :  { %v95_v59 = vmul.f32 %v145_v54, %v94_v58 }
  0xab   :  { %v99_v61 = vsel %vm98_vm5, %v145_v54, %v95_v59 }
  0xac   :  { %v101_v62 = vmul.f32 %v100_v60, %v99_v61 }
  0xae   :  { %107 = vperm.xlu2 %138, %v101_v62   ;;  %v103_v63 = vmul.f32 %v101_v62, %v78_v43 }
  0xb0   :  { %v104_v3 = vsub.f32 %v102_v2, %v103_v63 }
  0xb6   :  { %118 = vperm.xlu2 %138, %v104_v3  }
 0x108   :  { %v108_v6 = vpop.permute.xlu2 %107 }
 0x109   :  { %v112_v8 = vperm.slane %v108_v6, %v111_v7 }
 0x10b   :  { %v114_v10 = vmul.f32 %v112_v8, %v173_v0  ;;  %v115_v11 = vmul.f32 %v112_v8, %v178_v1 }
 0x110   :  { %v119_v9 = vpop.permute.xlu2 %118 }
 0x111   :  { %v123_v12 = vperm.slane %v119_v9, %v111_v7 }
 0x113   :  { %v125_v13 = vadd.f32 %v123_v12, %v114_v10  ;;  %v126_v14 = vadd.f32 %v123_v12, %v115_v11 }
 0x115   :  { %127 = vst [vmem:[%s215_s3] sm:$0xff] %v125_v13 }
 0x116   :  { %128 = vst [vmem:[%s215_s3 + $0x8] sm:$0xff] %v126_v14 }

</bundles_post_ra>
